<compile_context>
chip_gen: v7x
topology: tpu7x:2x2x1
jax: 0.10.0
libtpu: 0.0.40
codegen_flags: <defaults>
</compile_context>

<pallas_src>
import functools

import jax
import jax.numpy as jnp
from jax import lax
from jax.experimental import pallas as pl
from jax.experimental.pallas import tpu as pltpu


def _focal_bce_kernel(t_ref, coords_ref, x_ref, out_ref, acc_ref, *,
                      batch_tile, chunks_per_core, total_rows, need_row_mask,
                      inv_2sx2, inv_2sy2):
  """One grid step: partial BCE-with-logits sum over one (Bt, LXY) logits chunk."""
  p = pl.program_id(0)          # parallel (per-TensorCore) axis
  c = pl.program_id(1)          # sequential accumulation axis

  @pl.when(c == 0)
  def _init():
    acc_ref[...] = jnp.zeros_like(acc_ref)

  x = x_ref[...].astype(jnp.float32)        # (Bt, LXY) logits, cast in-kernel
  t = t_ref[...].astype(jnp.float32)        # (Bt, 2) target centers
  xc = t[:, 0:1]                            # (Bt, 1)
  yc = t[:, 1:2]                            # (Bt, 1)
  xg = coords_ref[0:1, :]                   # (1, LXY) flattened lateral coords
  yg = coords_ref[1:2, :]                   # (1, LXY) flattened longitudinal

  # Gaussian reference heatmap; broadcasts (Bt,1) x (1,LXY) -> (Bt, LXY).
  dx = xg - xc
  dy = yg - yc
  ref = jnp.exp(-(dx * dx) * inv_2sx2 - (dy * dy) * inv_2sy2)

  # Numerically stable binary_cross_entropy_with_logits per element:
  #   max(x, 0) - x*z + log(1 + exp(-|x|))
  per = jnp.maximum(x, 0.0) - x * ref + jnp.log(1.0 + jnp.exp(-jnp.abs(x)))

  if need_row_mask:             # static branch: only when B % Bt != 0
    row = lax.broadcasted_iota(jnp.int32, per.shape, 0)
    global_row = (p * chunks_per_core + c) * batch_tile + row
    per = jnp.where(global_row < total_rows, per, 0.0)

  # Per-step reduction (XLU) into a tiny (1, 1) VMEM accumulator.
  step = jnp.sum(per, axis=1, keepdims=True)       # lane reduce    -> (Bt, 1)
  step = jnp.sum(step, axis=0, keepdims=True)      # sublane reduce -> (1, 1)
  acc_ref[...] = acc_ref[...] + step

  @pl.when(c == pl.num_programs(1) - 1)
  def _finalize():
    out_ref[0] = acc_ref[...]                      # per-core partial BCE sum


_VMEM_BUDGET_BYTES = 12 * 1024 * 1024   # fits v5e's 16 MiB default scoped VMEM


def _choose_batch_tile(batch, lxy):
  """Largest batch-rows-per-step under the VMEM budget.

  Per-step footprint ~ 6 f32 planes per element: 2x double-buffered input
  block + a few compute temporaries (ref / per / dx / dy live ranges).
  """
  per_row_bytes = 6 * 4 * lxy
  max_rows = max(8, (_VMEM_BUDGET_BYTES // per_row_bytes) // 8 * 8)
  if batch <= max_rows:
    return batch                # single chunk; block dim == full dim is legal
  return max(8, min(max_rows, (batch // 8) * 8))


def focal_loss_interaction(inputs, targets, lateral, longitudinal, *,
                           sigmax, sigmay, alpha=0.25, gamma=2.0):
  """Pallas implementation of FocalLoss_interaction.forward.

  inputs:  (B, LX, LY) logits (any float dtype; cast to f32 inside the kernel)
  targets: (B, 2) = (x_center, y_center)
  lateral: (LX,) lateral axis values; longitudinal: (LY,) longitudinal values.
  """
  B, LX, LY = inputs.shape
  LXY = LX * LY

  # Flatten heatmaps row-major (metadata-only reshape; no HBM copy, no cast).
  x = inputs.reshape(B, LXY)
  targets = targets.astype(jnp.float32)

  # Flattened coordinate rows: xg[p] = lateral[p // LY], yg[p] = long[p % LY].
  lateral = lateral.astype(jnp.float32)
  longitudinal = longitudinal.astype(jnp.float32)
  coords = jnp.stack(
      [jnp.repeat(lateral, LY), jnp.tile(longitudinal, LX)], axis=0)  # (2, LXY)

  Bt = _choose_batch_tile(B, LXY)
  n_chunks = pl.cdiv(B, Bt)
  # v7x: shard the accumulation across both TensorCores when there is enough
  # work to amortize per-core overhead (needs an even chunk count so no block
  # falls entirely outside the batch).
  if n_chunks >= 4 and n_chunks % 2 == 0:
    n_par, cpc = 2, n_chunks // 2
  else:
    n_par, cpc = 1, n_chunks

  kernel = functools.partial(
      _focal_bce_kernel,
      batch_tile=Bt,
      chunks_per_core=cpc,
      total_rows=B,
      need_row_mask=(B % Bt != 0),
      inv_2sx2=1.0 / (2.0 * float(sigmax) ** 2),
      inv_2sy2=1.0 / (2.0 * float(sigmay) ** 2))

  partial_bce = pl.pallas_call(
      kernel,
      out_shape=jax.ShapeDtypeStruct((n_par, 1, 1), jnp.float32),
      grid_spec=pltpu.PrefetchScalarGridSpec(
          num_scalar_prefetch=0,
          grid=(n_par, cpc),
          in_specs=[
              # target centers: (Bt, 2) chunk.
              pl.BlockSpec((Bt, 2), lambda p, c: (p * cpc + c, 0)),
              # flattened coordinate rows: constant (2, LXY) block.
              pl.BlockSpec((2, LXY), lambda p, c: (0, 0)),
              # flattened logits: (Bt, LXY) chunk per step (full last dim).
              pl.BlockSpec((Bt, LXY), lambda p, c: (p * cpc + c, 0)),
          ],
          # One (1,1,1) partial-BCE block per parallel (core) index.
          out_specs=pl.BlockSpec((1, 1, 1), lambda p, c: (p, 0, 0)),
          scratch_shapes=[pltpu.VMEM((1, 1), jnp.float32)],
      ),
      compiler_params=pltpu.CompilerParams(
          dimension_semantics=("parallel", "arbitrary")),
  )(targets, coords, x)

  # The focal transform is nonlinear in the summed BCE, so it is applied after
  # combining the per-core partial sums (tiny scalar epilogue in JAX).
  bce = jnp.sum(partial_bce)
  return alpha * (1.0 - jnp.exp(-bce)) ** gamma * bce


def build_axes(para):
  """Reproduce the module's __init__ lateral/longitudinal axis vectors."""
  xmax, ymin, ymax = para['xmax'], para['ymin'], para['ymax']
  dx = dy = para['resolution']
  lateral = jnp.arange(int(-xmax / dx), int(xmax / dx) + 1,
                       dtype=jnp.float32) * dx
  longitudinal = jnp.arange(int(ymin / dy), int(ymax / dy) + 1,
                            dtype=jnp.float32) * dy
  return lateral, longitudinal


def focal_loss_interaction_ref(inputs, targets, lateral, longitudinal, *,
                               sigmax, sigmay, alpha=0.25, gamma=2.0):
  """Pure-JAX reference for validation (mirrors the PyTorch module)."""
  LX = lateral.shape[0]
  LY = longitudinal.shape[0]
  xgrid = jnp.tile(lateral[:, None], (1, LY))
  ygrid = jnp.tile(longitudinal[None, :], (LX, 1))
  xc = targets[:, 0][:, None, None]
  yc = targets[:, 1][:, None, None]
  ref = jnp.exp(-((xgrid[None] - xc) ** 2) / sigmax ** 2 / 2.0
                - ((ygrid[None] - yc) ** 2) / sigmay ** 2 / 2.0)
  x = inputs.astype(jnp.float32)
  per = jnp.maximum(x, 0.0) - x * ref + jnp.log1p(jnp.exp(-jnp.abs(x)))
  bce = jnp.sum(per)   # reduction='sum' in the original module
  return alpha * (1.0 - jnp.exp(-bce)) ** gamma * bce


if __name__ == "__main__":
  para = {
      'xmax': 8.0,
      'ymin': 0.0,
      'ymax': 15.0,
      'resolution': 1.0,
      'sigmax': 2.0,
      'sigmay': 3.0,
  }
  lateral, longitudinal = build_axes(para)        # len_x=17, len_y=16
  len_x = lateral.shape[0]
  len_y = longitudinal.shape[0]

  B = 2
  key = jax.random.PRNGKey(0)
  k1, k2 = jax.random.split(key)
  inputs = jax.random.normal(k1, (B, len_x, len_y), dtype=jnp.float32)
  targets = jnp.stack([
      jax.random.uniform(k2, (B,), minval=-4.0, maxval=4.0),
      jax.random.uniform(jax.random.fold_in(k2, 1), (B,), minval=2.0,
                         maxval=12.0),
  ], axis=1).astype(jnp.float32)

  loss = focal_loss_interaction(
      inputs, targets, lateral, longitudinal,
      sigmax=para['sigmax'], sigmay=para['sigmay'])
  loss = jax.block_until_ready(loss)

  loss_ref = focal_loss_interaction_ref(
      inputs, targets, lateral, longitudinal,
      sigmax=para['sigmax'], sigmay=para['sigmay'])

  assert jnp.allclose(loss, loss_ref, rtol=1e-4, atol=1e-5), (loss, loss_ref)
  print("KERNEL_OK")
</pallas_src>

<mosaic_0001>
module attributes {stable_mosaic.version = 11 : i64} {
  func.func @_focal_bce_kernel(%arg0: i32, %arg1: i32, %arg2: memref<2x2xf32, #tpu.memory_space<vmem>>, %arg3: memref<2x272xf32, #tpu.memory_space<vmem>>, %arg4: memref<2x272xf32, #tpu.memory_space<vmem>>, %arg5: memref<1x1x1xf32, #tpu.memory_space<vmem>>, %arg6: memref<1x1xf32, #tpu.memory_space<vmem>>) attributes {dimension_semantics = [#tpu.dimension_semantics<parallel>, #tpu.dimension_semantics<arbitrary>], iteration_bounds = array<i64: 1, 1>, scalar_prefetch = 0 : i64, scratch_operands = 1 : i64, tpu.core_type = #tpu.core_type<tc>, window_params = [{transform_indices = @transform_0, window_bounds = array<i64: 2, 2>}, {pipeline_mode = #tpu.pipeline_mode<synchronous>, transform_indices = @transform_1, window_bounds = array<i64: 2, 272>}, {transform_indices = @transform_2, window_bounds = array<i64: 2, 272>}, {transform_indices = @transform_3, window_bounds = array<i64: 1, 1, 1>}]} {
    %c0_i32 = arith.constant 0 : i32
    %0 = arith.cmpi eq, %arg1, %c0_i32 : i32
    %1 = arith.extui %0 : i1 to i32
    %c0_i32_0 = arith.constant 0 : i32
    %2 = arith.cmpi ne, %1, %c0_i32_0 : i32
    scf.if %2 {
      %cst_20 = arith.constant 0.000000e+00 : f32
      %47 = vector.broadcast %cst_20 : f32 to vector<1x1xf32>
      %c0_21 = arith.constant 0 : index
      %c0_22 = arith.constant 0 : index
      %48 = vector.load %arg6[%c0_21, %c0_22] : memref<1x1xf32, #tpu.memory_space<vmem>>, vector<1x1xf32>
      tpu.vector_store %arg6[%c0_21, %c0_22], %47 {strides = array<i32>} : memref<1x1xf32, #tpu.memory_space<vmem>>, vector<1x1xf32>,
    } else {
    }
    %c0 = arith.constant 0 : index
    %c0_1 = arith.constant 0 : index
    %3 = vector.load %arg4[%c0, %c0_1] : memref<2x272xf32, #tpu.memory_space<vmem>>, vector<2x272xf32>
    %c0_2 = arith.constant 0 : index
    %c0_3 = arith.constant 0 : index
    %4 = vector.load %arg2[%c0_2, %c0_3] : memref<2x2xf32, #tpu.memory_space<vmem>>, vector<2x2xf32>
    %5 = vector.extract_strided_slice %4 {offsets = [0, 0], sizes = [2, 1], strides = [1, 1]} : vector<2x2xf32> to vector<2x1xf32>
    %6 = vector.extract_strided_slice %4 {offsets = [0, 1], sizes = [2, 1], strides = [1, 1]} : vector<2x2xf32> to vector<2x1xf32>
    %c0_4 = arith.constant 0 : index
    %c0_5 = arith.constant 0 : index
    %7 = vector.load %arg3[%c0_4, %c0_5] : memref<2x272xf32, #tpu.memory_space<vmem>>, vector<1x272xf32>
    %c1 = arith.constant 1 : index
    %c0_6 = arith.constant 0 : index
    %8 = vector.load %arg3[%c1, %c0_6] : memref<2x272xf32, #tpu.memory_space<vmem>>, vector<1x272xf32>
    %9 = vector.broadcast %7 : vector<1x272xf32> to vector<2x272xf32>
    %10 = vector.broadcast %5 : vector<2x1xf32> to vector<2x272xf32>
    %11 = arith.subf %9, %10 : vector<2x272xf32>
    %12 = vector.broadcast %8 : vector<1x272xf32> to vector<2x272xf32>
    %13 = vector.broadcast %6 : vector<2x1xf32> to vector<2x272xf32>
    %14 = arith.subf %12, %13 : vector<2x272xf32>
    %15 = arith.mulf %11, %11 : vector<2x272xf32>
    %cst = arith.constant 0.000000e+00 : f32
    %16 = vector.broadcast %cst : f32 to vector<2x272xf32>
    %17 = arith.subf %16, %15 : vector<2x272xf32>
    %cst_7 = arith.constant 1.250000e-01 : f32
    %18 = vector.broadcast %cst_7 : f32 to vector<2x272xf32>
    %19 = arith.mulf %17, %18 : vector<2x272xf32>
    %20 = arith.mulf %14, %14 : vector<2x272xf32>
    %cst_8 = arith.constant 0.055555556 : f32
    %21 = vector.broadcast %cst_8 : f32 to vector<2x272xf32>
    %22 = arith.mulf %20, %21 : vector<2x272xf32>
    %23 = arith.subf %19, %22 : vector<2x272xf32>
    %24 = math.exp %23 : vector<2x272xf32>
    %cst_9 = arith.constant 0.000000e+00 : f32
    %25 = vector.broadcast %cst_9 : f32 to vector<2x272xf32>
    %26 = arith.maximumf %3, %25 : vector<2x272xf32>
    %27 = arith.mulf %3, %24 : vector<2x272xf32>
    %28 = arith.subf %26, %27 : vector<2x272xf32>
    %29 = math.absf %3 : vector<2x272xf32>
    %cst_10 = arith.constant 0.000000e+00 : f32
    %30 = vector.broadcast %cst_10 : f32 to vector<2x272xf32>
    %31 = arith.subf %30, %29 : vector<2x272xf32>
    %32 = math.exp %31 : vector<2x272xf32>
    %cst_11 = arith.constant 1.000000e+00 : f32
    %33 = vector.broadcast %cst_11 : f32 to vector<2x272xf32>
    %34 = arith.addf %33, %32 : vector<2x272xf32>
    %35 = math.log %34 : vector<2x272xf32>
    %36 = arith.addf %28, %35 : vector<2x272xf32>
    %cst_12 = arith.constant dense<0.000000e+00> : vector<2xf32>
    %37 = vector.multi_reduction <add>, %36, %cst_12 [1] : vector<2x272xf32> to vector<2xf32>
    %38 = vector.shape_cast %37 : vector<2xf32> to vector<2x1xf32>
    %cst_13 = arith.constant dense<0.000000e+00> : vector<1xf32>
    %39 = vector.multi_reduction <add>, %38, %cst_13 [0] : vector<2x1xf32> to vector<1xf32>
    %40 = vector.shape_cast %39 : vector<1xf32> to vector<1x1xf32>
    %c0_14 = arith.constant 0 : index
    %c0_15 = arith.constant 0 : index
    %41 = vector.load %arg6[%c0_14, %c0_15] : memref<1x1xf32, #tpu.memory_space<vmem>>, vector<1x1xf32>
    %42 = arith.addf %41, %40 : vector<1x1xf32>
    %c0_16 = arith.constant 0 : index
    %c0_17 = arith.constant 0 : index
    %43 = vector.load %arg6[%c0_16, %c0_17] : memref<1x1xf32, #tpu.memory_space<vmem>>, vector<1x1xf32>
    tpu.vector_store %arg6[%c0_16, %c0_17], %42 {strides = array<i32>} : memref<1x1xf32, #tpu.memory_space<vmem>>, vector<1x1xf32>,
    %c0_i32_18 = arith.constant 0 : i32
    %44 = arith.cmpi eq, %arg1, %c0_i32_18 : i32
    %45 = arith.extui %44 : i1 to i32
    %c0_i32_19 = arith.constant 0 : i32
    %46 = arith.cmpi ne, %45, %c0_i32_19 : i32
    scf.if %46 {
      %c0_20 = arith.constant 0 : index
      %c0_21 = arith.constant 0 : index
      %47 = vector.load %arg6[%c0_20, %c0_21] : memref<1x1xf32, #tpu.memory_space<vmem>>, vector<1x1xf32>
      %c0_22 = arith.constant 0 : index
      %c0_23 = arith.constant 0 : index
      %c0_24 = arith.constant 0 : index
      %48 = vector.load %arg5[%c0_22, %c0_23, %c0_24] : memref<1x1x1xf32, #tpu.memory_space<vmem>>, vector<1x1x1xf32>
      %49 = vector.shape_cast %48 : vector<1x1x1xf32> to vector<1x1xf32>
      %50 = vector.shape_cast %47 : vector<1x1xf32> to vector<1x1x1xf32>
      tpu.vector_store %arg5[%c0_22, %c0_23, %c0_24], %50 {strides = array<i32>} : memref<1x1x1xf32, #tpu.memory_space<vmem>>, vector<1x1x1xf32>,
    } else {
    }
    return
  }
  func.func @transform_0(%arg0: i32, %arg1: i32) -> (i32, i32) {
    %c1_i32 = arith.constant 1 : i32
    %0 = arith.muli %arg0, %c1_i32 : i32
    %1 = arith.addi %0, %arg1 : i32
    %c0_i32 = arith.constant 0 : i32
    %c0_i32_0 = arith.constant 0 : i32
    return %1, %c0_i32 : i32, i32
  }
  func.func @transform_1(%arg0: i32, %arg1: i32) -> (i32, i32) {
    %c0_i32 = arith.constant 0 : i32
    %c0_i32_0 = arith.constant 0 : i32
    %c0_i32_1 = arith.constant 0 : i32
    return %c0_i32, %c0_i32_0 : i32, i32
  }
  func.func @transform_2(%arg0: i32, %arg1: i32) -> (i32, i32) {
    %c1_i32 = arith.constant 1 : i32
    %0 = arith.muli %arg0, %c1_i32 : i32
    %1 = arith.addi %0, %arg1 : i32
    %c0_i32 = arith.constant 0 : i32
    %c0_i32_0 = arith.constant 0 : i32
    return %1, %c0_i32 : i32, i32
  }
  func.func @transform_3(%arg0: i32, %arg1: i32) -> (i32, i32, i32) {
    %c0_i32 = arith.constant 0 : i32
    %c0_i32_0 = arith.constant 0 : i32
    %c0_i32_1 = arith.constant 0 : i32
    return %arg0, %c0_i32, %c0_i32_0 : i32, i32, i32
  }
}

</mosaic_0001>

<bundles_post_ra>
// kernel: tpu_custom_call.1
= control target key start
LH: loop header
LB: loop body
LE: loop exit
PB: predicated region body
PF: predicated region fallthrough
CT: control target
= control target key end

     0   :  { %8 = vsyncpa [#allocation4], 0  ;;  %s408_s0 = inlined_call_operand.hbm [shape: f32[2,2], index: 0, kind: input, shape index: {}]   ;;  %s409_s1 = inlined_call_operand.hbm [shape: f32[2,272], index: 1, kind: input, shape index: {}]   ;;  %s410_s2 = inlined_call_operand.vmem [shape: f32[2,272], index: 2, kind: input, shape index: {}]   ;;  %s411_s3 = inlined_call_operand.hbm [shape: f32[1,1,1], index: 3, kind: output, shape index: {}]  }
   0x1   :  { %9 = vsyncpa [#allocation7], 0 }
   0x2   :  { %10 = vsyncpa [#allocation5], 0  ;;  %s334_s12 = smov [#allocation3]   ;;  %s335_s14 = smov [#allocation6]  }
   0x3   :  { %s20_s13 = sshll.u32 %s334_s12, 4  ;;  %s30_s15 = sshll.u32 %s335_s14, 4  ;;  %s21_s13 = int_to_ptr.vmem [resolvable:$true] %s20_s13  ;;  %s31_s15 = int_to_ptr.vmem [resolvable:$true] %s30_s15 }
   0x4   :  { %s262_s18 = scalar_lea.hbm %s408_s0, 32 }
   0x5   :  { %p263_p0 = scmp.ne.s32.totalorder %s408_s0, %s262_s18  ;;  %p266_p1 = scmp.lt.u32.totalorder %s262_s18, %s408_s0 }
   0x7   :  { %p268_p2 = pnand %p266_p1, %p263_p0 }
   0x9   :  { %271 = shalt.err (!%p268_p2)
}
   0xa   :  { %s272_s23 = scalar_lea.vmem %s21_s13, 32  ;;  %p277_p4 = scmp.lt.s32.totalorder %s21_s13, %s21_s13 }
   0xb   :  { %p273_p3 = scmp.ne.s32.totalorder %s21_s13, %s272_s23  ;;  %p278_p5 = scmp.lt.s32.totalorder %s272_s23, %s272_s23 }
   0xd   :  { %p279_p6 = por %p278_p5, %p277_p4 }
   0xf   :  { %p280_p7 = pnand %p279_p6, %p273_p3 }
  0x11   :  { %283 = shalt.err (!%p280_p7)
}
  0x12   :  { %23 = dma.hbm_to_vmem [thread:$0]  %s408_s0, 32, %s21_s13, [#allocation4]  }
  0x13   :  { %s284_s28 = scalar_lea.hbm %s409_s1, 96 }
  0x14   :  { %p285_p8 = scmp.ne.s32.totalorder %s409_s1, %s284_s28  ;;  %p288_p9 = scmp.lt.u32.totalorder %s284_s28, %s409_s1 }
  0x16   :  { %p290_p10 = pnand %p288_p9, %p285_p8 }
  0x18   :  { %293 = shalt.err (!%p290_p10)
}
  0x19   :  { %s294_s6 = scalar_lea.vmem %s31_s15, 96  ;;  %p299_p12 = scmp.lt.s32.totalorder %s31_s15, %s31_s15 }
  0x1a   :  { %p295_p11 = scmp.ne.s32.totalorder %s31_s15, %s294_s6  ;;  %p300_p13 = scmp.lt.s32.totalorder %s294_s6, %s294_s6 }
  0x1c   :  { %p301_p0 = por %p300_p13, %p299_p12 }
  0x1e   :  { %p302_p1 = pnand %p301_p0, %p295_p11 }
  0x20   :  { %305 = shalt.err (!%p302_p1)
}
  0x21   :  { %33 = dma.hbm_to_vmem [thread:$0]  %s409_s1, 96, %s31_s15, [#allocation7]  }
  0x22   :  { %328 = dma.done.wait [#allocation4], 32  }
  0x23   :  { %329 = vsyncadd [#allocation4], 4294967264 }
  0x24   :  { %330 = dma.done.wait [#allocation7], 96  }
  0x25   :  { %331 = vsyncadd [#allocation7], 4294967200  ;;  %v336_v0 = vmov 0   ;;  %v70_v1 = vld [vmem:[#allocation3] sm:$0x3]  ;;  %v337_v2 = vmov 1   ;;  %v75_v3 = vlaneseq }
  0x26   :  { %250 = vset.pattern.permute.xlu0 %v336_v0  ;;  %v388_v5 = vld [vmem:[%s410_s2] sm:$0x3f]  ;;  %v71_v10 = vld [vmem:[#allocation6] ss:$2 sm:$0x7]  ;;  %vm196_vm0 = vcmask 1041408  }
  0x27   :  { %92 = vperm.xlu0 %250, %v70_v1   ;;  %v76_v4 = vshrl.u32 %v75_v3, 7  ;;  %v168_v6 = vand.u32 2147483647, %v388_v5  ;;  %v73_v15 = vld [vmem:[#allocation6 + $0x1] ss:$2 sm:$0x7] }
  0x28   :  { %v338_v51 = vmov 1983009808   ;;  %v145_v62 = vmax.f32 %v388_v5, 0.0  ;;  %vm200_vm1 = vcmask 123904   ;;  %vm67_vm2 = vcmask 0   ;;  %s340_s1 = smov [#allocation8]  }
  0x29   :  { %v77_v7 = vsub.s32 0, %v76_v4  ;;  %v81_v8 = vsub.s32 1, %v76_v4  ;;  %v85_v9 = vsub.s32 2, %v76_v4  ;;  %v169_v11 = vsub.f32 0.0, %v168_v6  ;;  %s227_s2 = sshll.u32 %s340_s1, 4  ;;  %s228_s2 = int_to_ptr.vmem [resolvable:$true] %s227_s2 }
  0x2a   :  { %v151_v52 = vunpack.c.l.s4 %v338_v51  ;;  %s306_s10 = scalar_lea.vmem %s228_s2, 16  ;;  %s310_s11 = scalar_lea.vmem %s228_s2, 32 }
  0x2b   :  { %251 = vset.pattern.permute.xlu0 %v337_v2  ;;  %v78_v12 = vrot.slane %v71_v10, %v77_v7  ;;  %v82_v13 = vrot.slane %v71_v10, %v81_v8  ;;  %v86_v14 = vrot.slane %v71_v10, %v85_v9  ;;  %v170_v17 = vmul.f32 1.442695, %v169_v11  ;;  %p307_p2 = scmp.ne.s32.totalorder %s228_s2, %s306_s10  ;;  %p311_p3 = scmp.lt.s32.totalorder %s228_s2, %s228_s2 }
  0x2c   :  { %115 = vperm.xlu0 %251, %v70_v1   ;;  %v102_v21 = vrot.slane %v73_v15, %v77_v7  ;;  %v106_v22 = vrot.slane %v73_v15, %v81_v8  ;;  %v110_v23 = vrot.slane %v73_v15, %v85_v9  ;;  %v152_v53 = vunpack.c.0.s8 %v151_v52  ;;  %p312_p4 = scmp.lt.s32.totalorder %s310_s11, %s306_s10 }
  0x2d   :  { %252 = vpow2.f32 %v170_v17 }
  0x2e   :  { %v155_v55 = vsub.s32 %v152_v53, %v76_v4  ;;  %p313_p5 = por %p312_p4, %p311_p3 }
  0x30   :  { %p314_p6 = pnand %p313_p5, %p307_p2 }
  0x37   :  { %v253_v46 = vpop.eup %252 }
  0x38   :  { %v172_v50 = vadd.f32 1.0, %v253_v46 }
  0xa6   :  { %v93_v16 = vpop.permute.xlu0 %92 }
  0xa7   :  { %v95_v18 = vsub.f32 %v78_v12, %v93_v16  ;;  %v96_v19 = vsub.f32 %v82_v13, %v93_v16  ;;  %v97_v20 = vsub.f32 %v86_v14, %v93_v16  ;;  %v339_v14 = vmov 0.0  }
  0xa8   :  { %68 = vst.msk [vmem:[#allocation2] sm:$0x1] %vm67_vm2, %v339_v14 }
  0xa9   :  { %v121_v24 = vmul.f32 %v95_v18, %v95_v18  ;;  %v122_v25 = vmul.f32 %v96_v19, %v96_v19  ;;  %v123_v26 = vmul.f32 %v97_v20, %v97_v20 }
  0xab   :  { %v124_v27 = vsub.f32 0.0, %v121_v24  ;;  %v125_v28 = vsub.f32 0.0, %v122_v25  ;;  %v126_v29 = vsub.f32 0.0, %v123_v26  ;;  %v116_v30 = vpop.permute.xlu0 %115 }
  0xac   :  { %v118_v31 = vsub.f32 %v102_v21, %v116_v30  ;;  %v119_v32 = vsub.f32 %v106_v22, %v116_v30  ;;  %v120_v33 = vsub.f32 %v110_v23, %v116_v30 }
  0xad   :  { %v127_v37 = vmul.f32 0.125, %v124_v27  ;;  %v128_v38 = vmul.f32 0.125, %v125_v28  ;;  %v129_v39 = vmul.f32 0.125, %v126_v29 }
  0xae   :  { %v130_v34 = vmul.f32 %v118_v31, %v118_v31  ;;  %v131_v35 = vmul.f32 %v119_v32, %v119_v32  ;;  %v132_v36 = vmul.f32 %v120_v33, %v120_v33 }
  0xaf   :  { %v212_v21 = vld [vmem:[#allocation2] sm:$0x1] }
  0xb0   :  { %v133_v40 = vmul.f32 0.055555556, %v130_v34  ;;  %v134_v41 = vmul.f32 0.055555556, %v131_v35  ;;  %v135_v42 = vmul.f32 0.055555556, %v132_v36 }
  0xb2   :  { %v136_v43 = vsub.f32 %v127_v37, %v133_v40  ;;  %v137_v44 = vsub.f32 %v128_v38, %v134_v41  ;;  %v138_v45 = vsub.f32 %v129_v39, %v135_v42 }
  0xb4   :  { %v139_v47 = vmul.f32 1.442695, %v136_v43  ;;  %v141_v48 = vmul.f32 1.442695, %v137_v44  ;;  %v143_v49 = vmul.f32 1.442695, %v138_v45 }
  0xb6   :  { %254 = vpow2.f32 %v139_v47 }
  0xb7   :  { %256 = vpow2.f32 %v141_v48 }
  0xb8   :  { %258 = vpow2.f32 %v143_v49 }
  0xb9   :  { %260 = vlog2.f32 %v172_v50 }
  0xc0   :  { %v255_v54 = vpop.eup %254 }
  0xc1   :  { %v257_v56 = vpop.eup %256 }
  0xc2   :  { %v259_v57 = vpop.eup %258  ;;  %v149_v58 = vcombine.low %v255_v54, %v257_v56 }
  0xc3   :  { %v163_v60 = vrot.slane %v259_v57, %v155_v55  ;;  %v261_v61 = vpop.eup %260 }
  0xc4   :  { %v156_v59 = vrot.slane %v149_v58, %v155_v55  ;;  %v174_v1 = vmul.f32 0.6931472, %v261_v61 }
  0xc6   :  { %v164_v63 = vcombine.low %v156_v59, %v163_v60 }
  0xc8   :  { %v166_v0 = vmul.f32 %v164_v63, %v388_v5 }
  0xca   :  { %v167_v2 = vsub.f32 %v145_v62, %v166_v0 }
  0xcc   :  { %v175_v3 = vadd.f32 %v174_v1, %v167_v2 }
  0xce   :  { %v177_v6 = vcombine.high %v175_v3, %v175_v3  ;;  %v184_v7 = vrot.slane %v175_v3, %v155_v55 }
  0xd0   :  { %v191_v8 = vrot.slane %v177_v6, %v155_v55  ;;  %v192_v9 = vcombine.high %v184_v7, %v184_v7  ;;  %v197_v4 = vsel %vm196_vm0, %v184_v7, 0.0 }
  0xd2   :  { %v198_v10 = vsel %vm196_vm0, %v192_v9, 0.0  ;;  %v201_v12 = vsel %vm200_vm1, %v191_v8, 0.0 }
  0xd3   :  { %v199_v11 = vadd.f32 %v198_v10, %v197_v4 }
  0xd5   :  { %v202_v13 = vadd.f32 %v201_v12, %v199_v11 }
  0xd7   :  { %203 = vadd.xlane.f32.xlu1 %v202_v13 }
 0x164   :  { %v204_v5 = vpop.xlane.xlu1 %203 }
 0x165   :  { %v205_v15 = vsel %vm196_vm0, %v204_v5, 0.0 }
 0x166   :  { %v206_v16 = vrot.slane %v205_v15, 4 }
 0x168   :  { %v207_v17 = vadd.f32 %v206_v16, %v205_v15 }
 0x16a   :  { %v208_v18 = vrot.slane %v207_v17, 2 }
 0x16c   :  { %v209_v19 = vadd.f32 %v208_v18, %v207_v17 }
 0x16e   :  { %v210_v20 = vrot.slane %v209_v19, 1 }
 0x170   :  { %v211_v22 = vadd.f32 %v210_v20, %v209_v19 }
 0x172   :  { %v213_v23 = vadd.f32 %v212_v21, %v211_v22 }
 0x174   :  { %215 = vst.msk [vmem:[#allocation2] sm:$0x1] %vm67_vm2, %v213_v23 }
 0x17b   :  { %v219_v24 = vld [vmem:[#allocation2] sm:$0x1] }
 0x17c   :  { %220 = vst.msk [vmem:[#allocation8] sm:$0x1] %vm67_vm2, %v219_v24 }
 0x17d   :  { %317 = shalt.err (!%p314_p6)
}
 0x17e   :  { %s318_s14 = scalar_lea.hbm %s411_s3, 16 }
 0x17f   :  { %p319_p7 = scmp.ne.s32.totalorder %s411_s3, %s318_s14  ;;  %p322_p8 = scmp.lt.u32.totalorder %s318_s14, %s411_s3 }
 0x181   :  { %p324_p9 = pnand %p322_p8, %p319_p7 }
 0x183   :  { %327 = shalt.err (!%p324_p9)
}
 0x184   :  { %230 = dma.vmem_to_hbm [thread:$0]  %s228_s2, 16, %s411_s3, [#allocation5]  }
 0x185   :  { %332 = dma.done.wait [#allocation5], 16  }
 0x186   :  { %333 = vsyncadd [#allocation5], 4294967280 }
 0x187   :  { %234 = vsyncpa [#allocation4], 1 }
 0x188   :  { %235 = vsyncpa [#allocation7], 1 }
 0x189   :  { %236 = vsyncpa [#allocation5], 1 }

</bundles_post_ra>
